<compile_context>
chip_gen: v7x
topology: tpu7x:2x2x1
jax: 0.10.0
libtpu: 0.0.40
codegen_flags: <defaults>
</compile_context>

<pallas_src>
import functools

import jax
import jax.numpy as jnp
from jax.experimental import pallas as pl
from jax.experimental.pallas import tpu as pltpu


def _rmsnorm_kernel(x_ref, g_ref, o_ref, *, h, eps, bf16_store):
    # x_ref: (tm, H) tile (H = full hidden dim, possibly not lane-aligned)
    # g_ref: (1,) gamma scalar in SMEM
    x = x_ref[...]
    xf = x.astype(jnp.float32)

    # Single-pass mean of squares over the true hidden size h (f32 accumulate).
    ms = jnp.sum(xf * xf, axis=-1, keepdims=True) * (1.0 / h)
    # EUP rsqrt; gamma folded into the per-row (tm,1) scale.
    scale = jax.lax.rsqrt(ms + eps) * g_ref[0]

    if bf16_store:
        # v6e/v7x bf16 VALU: store-path multiply in bf16 (output is bf16 anyway).
        o_ref[...] = x * scale.astype(x.dtype)
    else:
        o_ref[...] = (xf * scale).astype(o_ref.dtype)


def _sublane_step(dtype):
    isz = jnp.dtype(dtype).itemsize
    if isz >= 4:
        return 8
    if isz == 2:
        return 16
    return 32


def _vmem_capacity_bytes():
    try:
        return int(pltpu.get_tpu_info().vmem_capacity_bytes)
    except Exception:
        return 64 * 1024 * 1024  # conservative per-TC floor (v7x)


def _has_bf16_vpu():
    try:
        kind = jax.devices()[0].device_kind.lower()
    except Exception:
        return False
    # v5e and older have no bf16 VPU; v6e / v7x do.
    return not any(t in kind for t in ("v2", "v3", "v4", "v5"))


@functools.partial(jax.jit, static_argnames=("eps", "tile_bytes"))
def rmsnorm(x, gamma, *, eps=1e-9, tile_bytes=4 * 1024 * 1024):
    """Pallas RMSNorm. x: (..., 1, H) or (..., H); gamma: scalar or (1,)."""
    if x.ndim >= 2 and x.shape[-2] == 1:
        x = jnp.squeeze(x, axis=-2)          # torch's x.squeeze(-2)
    out_shape = x.shape
    H = x.shape[-1]
    M = 1
    for d in x.shape[:-1]:
        M *= d
    x2 = x.reshape(M, H)                      # no lane padding: full-H blocks

    dtype = x2.dtype
    itemsize = jnp.dtype(dtype).itemsize
    step = _sublane_step(dtype)

    # Byte-budgeted row tile, aligned to the dtype-aware sublane step.
    row_bytes = max(1, H * itemsize)
    tm = max(step, (int(tile_bytes // row_bytes) // step) * step)
    if tm >= M:
        tm = M                                # whole-dim block is always legal
    grid_m = pl.cdiv(M, tm)                   # ragged last block: DMAs are clipped

    tile_b = tm * H * itemsize
    # Triple-buffer the input only when tiles are small and there is enough
    # grid depth to pipeline (pure DMA streaming kernel).
    want_triple = (grid_m >= 4) and (tile_b < (512 << 10))

    n_in_bufs = 2
    x_spec = pl.BlockSpec((tm, H), lambda i: (i, 0))
    if want_triple:
        try:
            x_spec = pl.BlockSpec((tm, H), lambda i: (i, 0),
                                  pipeline_mode=pl.Buffered(3))
            n_in_bufs = 3
        except (TypeError, AttributeError):
            pass                               # fall back to default double-buffering

    # Generation-aware VMEM cap (~48 MiB v7x, ~96 MiB v5e/v6e).
    cap = int(0.75 * _vmem_capacity_bytes())
    vmem_needed = (n_in_bufs + 2) * tile_b + (2 << 20)
    vmem_limit = max(4 << 20, min(cap, vmem_needed))

    g = jnp.asarray(gamma, jnp.float32).reshape((1,))

    kernel = functools.partial(
        _rmsnorm_kernel, h=H, eps=eps,
        bf16_store=(dtype == jnp.bfloat16 and _has_bf16_vpu()))

    out = pl.pallas_call(
        kernel,
        out_shape=jax.ShapeDtypeStruct((M, H), dtype),
        grid_spec=pltpu.PrefetchScalarGridSpec(
            num_scalar_prefetch=0,
            grid=(grid_m,),
            in_specs=[
                x_spec,                                             # x tile
                pl.BlockSpec(memory_space=pltpu.MemorySpace.SMEM),  # [gamma]
            ],
            out_specs=pl.BlockSpec((tm, H), lambda i: (i, 0)),
        ),
        compiler_params=pltpu.CompilerParams(
            dimension_semantics=("parallel",),
            vmem_limit_bytes=int(vmem_limit),
        ),
    )(x2, g)

    return out.reshape(out_shape)


def _reference(x, gamma, eps):
    xs = jnp.squeeze(x, axis=-2) if (x.ndim >= 2 and x.shape[-2] == 1) else x
    rms = jnp.sqrt(jnp.mean(xs * xs, axis=-1, keepdims=True) + eps)
    return gamma * xs / rms


if __name__ == "__main__":
    key = jax.random.PRNGKey(0)
    k1, k2 = jax.random.split(key)

    # Test 1: module-shaped input (B, S, 1, H) so x.squeeze(-2) is meaningful.
    B, S, H = 2, 8, 32
    eps = 1e-9
    x = jax.random.normal(k1, (B, S, 1, H), dtype=jnp.float32)
    gamma = jnp.ones((1,), dtype=jnp.float32)       # nn.Parameter(torch.ones(1))

    out = jax.block_until_ready(rmsnorm(x, gamma, eps=eps))
    ref = _reference(x, gamma[0], eps)
    assert out.shape == ref.shape, "shape mismatch vs reference (test 1)"
    assert jnp.allclose(out, ref, atol=1e-4, rtol=1e-4), "mismatch vs reference (test 1)"

    # Test 2: ragged grid (M=50 not a multiple of 8), unaligned H, gamma != 1,
    # tiny tile budget to exercise the cdiv/masked-store/triple-buffer paths.
    eps2 = 1e-6
    x2 = jax.random.normal(k2, (2, 25, 1, 96), dtype=jnp.float32)
    gamma2 = jnp.full((1,), 1.5, dtype=jnp.float32)

    out2 = jax.block_until_ready(rmsnorm(x2, gamma2, eps=eps2, tile_bytes=2048))
    ref2 = _reference(x2, gamma2[0], eps2)
    assert out2.shape == ref2.shape, "shape mismatch vs reference (test 2)"
    assert jnp.allclose(out2, ref2, atol=1e-4, rtol=1e-4), "mismatch vs reference (test 2)"

    print("KERNEL_OK")
</pallas_src>

<mosaic_0001>
module attributes {stable_mosaic.version = 11 : i64} {
  func.func @_rmsnorm_kernel(%arg0: i32, %arg1: memref<16x32xf32, #tpu.memory_space<vmem>>, %arg2: memref<1xf32, #tpu.memory_space<smem>>, %arg3: memref<16x32xf32, #tpu.memory_space<vmem>>) attributes {dimension_semantics = [#tpu.dimension_semantics<parallel>], iteration_bounds = array<i64: 1>, scalar_prefetch = 0 : i64, scratch_operands = 0 : i64, tpu.core_type = #tpu.core_type<tc>, window_params = [{transform_indices = @transform_0, window_bounds = array<i64: 16, 32>}, {transform_indices = @transform_1, window_bounds = array<i64: 1>}, {transform_indices = @transform_2, window_bounds = array<i64: 16, 32>}]} {
    %c0 = arith.constant 0 : index
    %c0_0 = arith.constant 0 : index
    %0 = vector.load %arg1[%c0, %c0_0] : memref<16x32xf32, #tpu.memory_space<vmem>>, vector<16x32xf32>
    %1 = arith.mulf %0, %0 : vector<16x32xf32>
    %cst = arith.constant dense<0.000000e+00> : vector<16xf32>
    %2 = vector.multi_reduction <add>, %1, %cst [1] : vector<16x32xf32> to vector<16xf32>
    %3 = vector.shape_cast %2 : vector<16xf32> to vector<16x1xf32>
    %cst_1 = arith.constant 3.125000e-02 : f32
    %4 = vector.broadcast %cst_1 : f32 to vector<16x1xf32>
    %5 = arith.mulf %3, %4 : vector<16x1xf32>
    %cst_2 = arith.constant 9.99999971E-10 : f32
    %6 = vector.broadcast %cst_2 : f32 to vector<16x1xf32>
    %7 = arith.addf %5, %6 : vector<16x1xf32>
    %8 = math.rsqrt %7 : vector<16x1xf32>
    %c0_3 = arith.constant 0 : index
    %9 = memref.load %arg2[%c0_3] : memref<1xf32, #tpu.memory_space<smem>>
    %10 = vector.broadcast %9 : f32 to vector<16x1xf32>
    %11 = arith.mulf %8, %10 : vector<16x1xf32>
    %12 = vector.broadcast %11 : vector<16x1xf32> to vector<16x32xf32>
    %13 = arith.mulf %0, %12 : vector<16x32xf32>
    %c0_4 = arith.constant 0 : index
    %c0_5 = arith.constant 0 : index
    %14 = vector.load %arg3[%c0_4, %c0_5] : memref<16x32xf32, #tpu.memory_space<vmem>>, vector<16x32xf32>
    tpu.vector_store %arg3[%c0_4, %c0_5], %13 {strides = array<i32>} : memref<16x32xf32, #tpu.memory_space<vmem>>, vector<16x32xf32>,
    return
  }
  func.func @transform_0(%arg0: i32) -> (i32, i32) {
    %c0_i32 = arith.constant 0 : i32
    %c0_i32_0 = arith.constant 0 : i32
    return %arg0, %c0_i32 : i32, i32
  }
  func.func @transform_1(%arg0: i32) -> i32 {
    %c0_i32 = arith.constant 0 : i32
    %c0_i32_0 = arith.constant 0 : i32
    return %c0_i32 : i32
  }
  func.func @transform_2(%arg0: i32) -> (i32, i32) {
    %c0_i32 = arith.constant 0 : i32
    %c0_i32_0 = arith.constant 0 : i32
    return %arg0, %c0_i32 : i32, i32
  }
}

</mosaic_0001>

<bundles_post_ra>
// kernel: rmsnorm.1
= control target key start
LH: loop header
LB: loop body
LE: loop exit
PB: predicated region body
PF: predicated region fallthrough
CT: control target
= control target key end

     0   :  { %8 = vsyncpa [#allocation4], 0  ;;  %s181_s0 = inlined_call_operand.hbm [shape: f32[16,32], index: 0, kind: input, shape index: {}]   ;;  %s182_s1 = inlined_call_operand.<no memory space> [shape: f32[1], index: 1, kind: input, shape index: {}]   ;;  %s183_s2 = inlined_call_operand.hbm [shape: f32[16,32], index: 2, kind: output, shape index: {}]  }
   0x1   :  { %9 = vsyncpa [#allocation5], 0  ;;  %s125_s9 = smov [#allocation3]   ;;  %s77_s13 = scalar_lea.hbm %s181_s0, 256 }
   0x2   :  { %s15_s10 = sshll.u32 %s125_s9, 4  ;;  %p78_p0 = scmp.ne.s32.totalorder %s181_s0, %s77_s13  ;;  %s16_s10 = int_to_ptr.vmem [resolvable:$true] %s15_s10 }
   0x3   :  { %p81_p1 = scmp.lt.u32.totalorder %s77_s13, %s181_s0 }
   0x5   :  { %p83_p2 = pnand %p81_p1, %p78_p0 }
   0x7   :  { %86 = shalt.err (!%p83_p2)
}
   0x8   :  { %s87_s18 = scalar_lea.vmem %s16_s10, 256  ;;  %p92_p4 = scmp.lt.s32.totalorder %s16_s10, %s16_s10 }
   0x9   :  { %p88_p3 = scmp.ne.s32.totalorder %s16_s10, %s87_s18  ;;  %p93_p5 = scmp.lt.s32.totalorder %s87_s18, %s87_s18 }
   0xb   :  { %p94_p6 = por %p93_p5, %p92_p4 }
   0xd   :  { %p95_p7 = pnand %p94_p6, %p88_p3 }
   0xf   :  { %98 = shalt.err (!%p95_p7)
}
  0x10   :  { %s126_s19 = smov 128   ;;  %s127_s20 = smov 8  }
  0x11   :  { %21 = dma.hbm_to_vmem [thread:$0]  %s181_s0, 256, %s16_s10, [#allocation4], %s126_s19, %s126_s19, %s127_s20  }
  0x12   :  { %121 = dma.done.wait [#allocation4], 256  }
  0x13   :  { %122 = vsyncadd [#allocation4], 4294967040  ;;  %v27_v0 = vld [vmem:[#allocation3] sm:$0xff]  ;;  %vm31_vm0 = vcmask 261120   ;;  %v28_v1 = vld [vmem:[#allocation3 + $0x8] sm:$0xff]  ;;  %v45_v12 = vstv %s182_s1  ;;  %s128_s24 = smov [#allocation6]  }
  0x14   :  { %v29_v2 = vmul.f32 %v27_v0, %v27_v0  ;;  %v30_v3 = vmul.f32 %v28_v1, %v28_v1  ;;  %s57_s25 = sshll.u32 %s128_s24, 4  ;;  %s58_s25 = int_to_ptr.vmem [resolvable:$true] %s57_s25 }
  0x15   :  { %s99_s26 = scalar_lea.vmem %s58_s25, 256  ;;  %p104_p9 = scmp.lt.s32.totalorder %s58_s25, %s58_s25 }
  0x16   :  { %v32_v4 = vsel %vm31_vm0, %v29_v2, 0.0  ;;  %v35_v5 = vsel %vm31_vm0, %v30_v3, 0.0  ;;  %p100_p8 = scmp.ne.s32.totalorder %s58_s25, %s99_s26  ;;  %p105_p10 = scmp.lt.s32.totalorder %s99_s26, %s99_s26 }
  0x17   :  { %33 = vadd.xlane.f32.xlu0 %v32_v4 }
  0x18   :  { %p106_p11 = por %p105_p10, %p104_p9 }
  0x1a   :  { %p107_p12 = pnand %p106_p11, %p100_p8 }
  0x1b   :  { %36 = vadd.xlane.f32.xlu0 %v35_v5 }
  0xa4   :  { %v34_v6 = vpop.xlane.xlu0 %33 }
  0xa5   :  { %v38_v7 = vmul.f32 0.03125, %v34_v6 }
  0xa7   :  { %v40_v8 = vadd.f32 1e-09, %v38_v7 }
  0xa8   :  { %v37_v9 = vpop.xlane.xlu0 %36 }
  0xa9   :  { %73 = vrsqrt.f32 %v40_v8  ;;  %v39_v10 = vmul.f32 0.03125, %v37_v9 }
  0xab   :  { %v41_v11 = vadd.f32 1e-09, %v39_v10 }
  0xad   :  { %75 = vrsqrt.f32 %v41_v11 }
  0xb3   :  { %v74_v13 = vpop.eup %73 }
  0xb4   :  { %v46_v14 = vmul.f32 %v74_v13, %v45_v12 }
  0xb6   :  { %v48_v15 = vmul.f32 %v46_v14, %v27_v0 }
  0xb7   :  { %v76_v16 = vpop.eup %75 }
  0xb8   :  { %v47_v17 = vmul.f32 %v76_v16, %v45_v12  ;;  %50 = vst.msk [vmem:[#allocation6] sm:$0xff] %vm31_vm0, %v48_v15 }
  0xba   :  { %v49_v18 = vmul.f32 %v47_v17, %v28_v1 }
  0xbc   :  { %51 = vst.msk [vmem:[#allocation6 + $0x8] sm:$0xff] %vm31_vm0, %v49_v18 }
  0xbd   :  { %110 = shalt.err (!%p107_p12)
}
  0xbe   :  { %s111_s28 = scalar_lea.hbm %s183_s2, 256 }
  0xbf   :  { %p112_p13 = scmp.ne.s32.totalorder %s183_s2, %s111_s28  ;;  %p115_p0 = scmp.lt.u32.totalorder %s111_s28, %s183_s2 }
  0xc1   :  { %p117_p1 = pnand %p115_p0, %p112_p13 }
  0xc3   :  { %120 = shalt.err (!%p117_p1)
}
  0xc4   :  { %63 = dma.vmem_to_hbm [thread:$0]  %s58_s25, 256, %s183_s2, [#allocation5], %s126_s19, %s126_s19, %s127_s20  }
  0xc5   :  { %123 = dma.done.wait [#allocation5], 256  }
  0xc6   :  { %124 = vsyncadd [#allocation5], 4294967040 }
  0xc7   :  { %67 = vsyncpa [#allocation4], 1 }
  0xc8   :  { %68 = vsyncpa [#allocation5], 1 }

</bundles_post_ra>
